<compile_context>
chip_gen: v5e
topology: v5e:2x2
jax: 0.10.0
libtpu: 0.0.40
codegen_flags: <defaults>
</compile_context>

<pallas_src>
import jax
import jax.numpy as jnp
from jax.experimental import pallas as pl
from jax.experimental.pallas import tpu as pltpu


def _round_up(n, m):
    return ((n + m - 1) // m) * m


def _mlp_kernel(x_ref, w1_ref, b1_ref, w2_ref, out_ref):
    # h = x @ W1 + b1   (lane-dense: Hp is a multiple of 128; b1[H] == 1 is the
    # "bias unit" that carries b2 through the second matmul)
    h = jnp.dot(x_ref[...], w1_ref[...], preferred_element_type=jnp.float32)
    h = h + b1_ref[...]                      # (TB, Hp) + (1, Hp) broadcast
    # LeakyReLU, negative_slope = 0.01 (PyTorch default); LeakyReLU(1) == 1.
    h = jnp.where(h > 0, h, 0.01 * h)
    # out = h @ W2  (W2 row H holds b2, so the bias is added by the MXU).
    out_ref[...] = jnp.dot(
        h, w2_ref[...], preferred_element_type=jnp.float32
    ).astype(out_ref.dtype)


def pack_params(w1, b1, w2, b2):
    """One-time packing (outside the hot path).

    w1: (H, D_in), b1: (H,), w2: (D_out, H), b2: (D_out,)   (PyTorch layout)

    Produces:
      w1p: (D_in, Hp)   transposed, hidden padded to 128 lanes
      b1p: (1, Hp)      b1 with b1p[H] = 1.0 (bias unit)
      w2p: (Hp, D_out)  transposed, row H = b2, padded rows zero
    The extra hidden columns are inert: x@W1 contributes 0 there, LeakyReLU(0)=0,
    and the matching W2 rows are 0 — except column H which is exactly the bias
    path (0 + 1 -> LeakyReLU -> 1 -> * b2).
    """
    H, D_in = w1.shape
    D_out = w2.shape[0]
    Hp = _round_up(H + 1, 128)  # +1 reserves the bias-unit column

    w1p = jnp.zeros((D_in, Hp), jnp.float32).at[:, :H].set(w1.T)
    b1p = jnp.zeros((1, Hp), jnp.float32).at[0, :H].set(b1).at[0, H].set(1.0)
    w2p = jnp.zeros((Hp, D_out), jnp.float32).at[:H, :].set(w2.T).at[H, :].set(b2)
    return dict(w1=w1p, b1=b1p, w2=w2p, D_in=D_in, H=H, D_out=D_out)


def cnn_forward(x, packed):
    """x: (B, D_in) float32.  packed: output of pack_params."""
    assert x.dtype == jnp.float32, "cnn_forward expects float32 activations"
    B, D_in = x.shape
    w1p, b1p, w2p = packed["w1"], packed["b1"], packed["w2"]
    assert D_in == packed["D_in"]
    Hp = w1p.shape[1]
    D_out = w2p.shape[1]

    MAX_TB = 512
    if B <= 8:
        # Tiny batch: single block equal to the full array dims -> no pad, no slice.
        TB, Bp = B, B
        x_in = x
    else:
        B8 = _round_up(B, 8)
        # Split into >= 2 grid steps when possible (uses both v7x TensorCores),
        # capped at 512 rows per tile (well within VMEM on all generations).
        TB = min(MAX_TB, _round_up((B8 + 1) // 2, 8))
        Bp = _round_up(B, TB)
        x_in = x if Bp == B else jnp.pad(x, ((0, Bp - B), (0, 0)))

    grid = (Bp // TB,)

    out = pl.pallas_call(
        _mlp_kernel,
        out_shape=jax.ShapeDtypeStruct((Bp, D_out), jnp.float32),
        grid=grid,
        in_specs=[
            pl.BlockSpec((TB, D_in), lambda i: (i, 0)),   # x tile, walks batch
            pl.BlockSpec((D_in, Hp), lambda i: (0, 0)),   # weights stay VMEM-resident
            pl.BlockSpec((1, Hp), lambda i: (0, 0)),
            pl.BlockSpec((Hp, D_out), lambda i: (0, 0)),
        ],
        # Narrow (unpadded) output block: 16x fewer HBM writeback bytes than a
        # 128-lane-padded store; last dim equals the full array dim -> legal.
        out_specs=pl.BlockSpec((TB, D_out), lambda i: (i, 0)),
        compiler_params=pltpu.CompilerParams(
            dimension_semantics=("parallel",),
        ),
    )(x_in, w1p, b1p, w2p)

    return out if Bp == B else out[:B]


def init_params(key, input_size, output_size):
    """Deterministic init mimicking PyTorch nn.Linear default (U[-1/sqrt(fan_in), +])."""
    hidden = int(input_size * 2 / 3) + output_size
    k1, k2, k3, k4 = jax.random.split(key, 4)

    bound1 = 1.0 / (input_size ** 0.5)
    w1 = jax.random.uniform(k1, (hidden, input_size), jnp.float32, -bound1, bound1)
    b1 = jax.random.uniform(k2, (hidden,), jnp.float32, -bound1, bound1)

    bound2 = 1.0 / (hidden ** 0.5)
    w2 = jax.random.uniform(k3, (output_size, hidden), jnp.float32, -bound2, bound2)
    b2 = jax.random.uniform(k4, (output_size,), jnp.float32, -bound2, bound2)
    return w1, b1, w2, b2


def _reference(x, w1, b1, w2, b2):
    h = x @ w1.T + b1
    h = jnp.where(h > 0, h, 0.01 * h)
    return h @ w2.T + b2


if __name__ == "__main__":
    # TODO(synk): layer1 (Conv1d+ReLU) / layer2 (MaxPool1d+Flatten) are defined in
    # __init__ but never used in forward(), so they are intentionally not implemented.
    batch = 2
    input_size = 32
    output_size = 8

    key = jax.random.PRNGKey(0)
    kx, kp, kx2 = jax.random.split(key, 3)
    x = jax.random.normal(kx, (batch, input_size), jnp.float32)
    w1, b1, w2, b2 = init_params(kp, input_size, output_size)

    # One-time packing (transpose + lane padding + bias folding) outside the hot path.
    packed = pack_params(w1, b1, w2, b2)

    # Tiny-batch path (single full-array block, no padding).
    out = jax.block_until_ready(cnn_forward(x, packed))
    ref = _reference(x, w1, b1, w2, b2)
    assert out.shape == (batch, output_size)
    assert jnp.allclose(out, ref, atol=2e-5, rtol=1e-5)

    # Multi-step grid path (exercises batch tiling + pad/slice).
    big_batch = 300
    x_big = jax.random.normal(kx2, (big_batch, input_size), jnp.float32)
    out_big = jax.block_until_ready(cnn_forward(x_big, packed))
    ref_big = _reference(x_big, w1, b1, w2, b2)
    assert out_big.shape == (big_batch, output_size)
    assert jnp.allclose(out_big, ref_big, atol=2e-5, rtol=1e-5)

    print("KERNEL_OK")
</pallas_src>

<mosaic_0001>
module attributes {stable_mosaic.version = 11 : i64} {
  func.func @_mlp_kernel(%arg0: i32, %arg1: memref<2x32xf32, #tpu.memory_space<vmem>>, %arg2: memref<32x128xf32, #tpu.memory_space<vmem>>, %arg3: memref<1x128xf32, #tpu.memory_space<vmem>>, %arg4: memref<128x8xf32, #tpu.memory_space<vmem>>, %arg5: memref<2x8xf32, #tpu.memory_space<vmem>>) attributes {dimension_semantics = [#tpu.dimension_semantics<parallel>], iteration_bounds = array<i64: 1>, scalar_prefetch = 0 : i64, scratch_operands = 0 : i64, tpu.core_type = #tpu.core_type<tc>, window_params = [{transform_indices = @transform_0, window_bounds = array<i64: 2, 32>}, {pipeline_mode = #tpu.pipeline_mode<synchronous>, transform_indices = @transform_1, window_bounds = array<i64: 32, 128>}, {pipeline_mode = #tpu.pipeline_mode<synchronous>, transform_indices = @transform_2, window_bounds = array<i64: 1, 128>}, {pipeline_mode = #tpu.pipeline_mode<synchronous>, transform_indices = @transform_3, window_bounds = array<i64: 128, 8>}, {transform_indices = @transform_4, window_bounds = array<i64: 2, 8>}]} {
    %c0 = arith.constant 0 : index
    %c0_0 = arith.constant 0 : index
    %0 = vector.load %arg1[%c0, %c0_0] : memref<2x32xf32, #tpu.memory_space<vmem>>, vector<2x32xf32>
    %c0_1 = arith.constant 0 : index
    %c0_2 = arith.constant 0 : index
    %1 = vector.load %arg2[%c0_1, %c0_2] : memref<32x128xf32, #tpu.memory_space<vmem>>, vector<32x128xf32>
    %cst = arith.constant dense<0.000000e+00> : vector<2x128xf32>
    %2 = tpu.matmul %0, %1, %cst {dimension_numbers = #tpu.dot_dimension_numbers<[1], [0], [0], [1], [0, 0, 1, 1], [], []>} : vector<2x32xf32>, vector<32x128xf32>, vector<2x128xf32> -> vector<2x128xf32>
    %c0_3 = arith.constant 0 : index
    %c0_4 = arith.constant 0 : index
    %3 = vector.load %arg3[%c0_3, %c0_4] : memref<1x128xf32, #tpu.memory_space<vmem>>, vector<1x128xf32>
    %4 = vector.broadcast %3 : vector<1x128xf32> to vector<2x128xf32>
    %5 = arith.addf %2, %4 : vector<2x128xf32>
    %cst_5 = arith.constant 0.000000e+00 : f32
    %6 = vector.broadcast %cst_5 : f32 to vector<2x128xf32>
    %7 = arith.cmpf ogt, %5, %6 : vector<2x128xf32>
    %cst_6 = arith.constant 0.00999999977 : f32
    %8 = vector.broadcast %cst_6 : f32 to vector<2x128xf32>
    %9 = arith.mulf %8, %5 : vector<2x128xf32>
    %10 = arith.select %7, %5, %9 : vector<2x128xi1>, vector<2x128xf32>
    %c0_7 = arith.constant 0 : index
    %c0_8 = arith.constant 0 : index
    %11 = vector.load %arg4[%c0_7, %c0_8] : memref<128x8xf32, #tpu.memory_space<vmem>>, vector<128x8xf32>
    %cst_9 = arith.constant dense<0.000000e+00> : vector<2x8xf32>
    %12 = tpu.matmul %10, %11, %cst_9 {dimension_numbers = #tpu.dot_dimension_numbers<[1], [0], [0], [1], [0, 0, 1, 1], [], []>} : vector<2x128xf32>, vector<128x8xf32>, vector<2x8xf32> -> vector<2x8xf32>
    %c0_10 = arith.constant 0 : index
    %c0_11 = arith.constant 0 : index
    %13 = vector.load %arg5[%c0_10, %c0_11] : memref<2x8xf32, #tpu.memory_space<vmem>>, vector<2x8xf32>
    tpu.vector_store %arg5[%c0_10, %c0_11], %12 {strides = array<i32>} : memref<2x8xf32, #tpu.memory_space<vmem>>, vector<2x8xf32>,
    return
  }
  func.func @transform_0(%arg0: i32) -> (i32, i32) {
    %c0_i32 = arith.constant 0 : i32
    %c0_i32_0 = arith.constant 0 : i32
    return %arg0, %c0_i32 : i32, i32
  }
  func.func @transform_1(%arg0: i32) -> (i32, i32) {
    %c0_i32 = arith.constant 0 : i32
    %c0_i32_0 = arith.constant 0 : i32
    %c0_i32_1 = arith.constant 0 : i32
    return %c0_i32, %c0_i32_0 : i32, i32
  }
  func.func @transform_2(%arg0: i32) -> (i32, i32) {
    %c0_i32 = arith.constant 0 : i32
    %c0_i32_0 = arith.constant 0 : i32
    %c0_i32_1 = arith.constant 0 : i32
    return %c0_i32, %c0_i32_0 : i32, i32
  }
  func.func @transform_3(%arg0: i32) -> (i32, i32) {
    %c0_i32 = arith.constant 0 : i32
    %c0_i32_0 = arith.constant 0 : i32
    %c0_i32_1 = arith.constant 0 : i32
    return %c0_i32, %c0_i32_0 : i32, i32
  }
  func.func @transform_4(%arg0: i32) -> (i32, i32) {
    %c0_i32 = arith.constant 0 : i32
    %c0_i32_0 = arith.constant 0 : i32
    return %arg0, %c0_i32 : i32, i32
  }
}

</mosaic_0001>

<bundles_post_ra>
// kernel: tpu_custom_call.1
= control target key start
LH: loop header
LB: loop body
LE: loop exit
PB: predicated region body
PF: predicated region fallthrough
CT: control target
= control target key end

     0   :  { %vm27_vm0 = vcmask 261120   ;;  %s232_s0 = inlined_call_operand.vmem [shape: f32[2,32], index: 0, kind: input, shape index: {}]   ;;  %s233_s1 = inlined_call_operand.vmem [shape: f32[32,128], index: 1, kind: input, shape index: {}]   ;;  %s234_s2 = inlined_call_operand.vmem [shape: f32[1,128], index: 2, kind: input, shape index: {}]   ;;  %s235_s3 = inlined_call_operand.vmem [shape: f32[128,8], index: 3, kind: input, shape index: {}]   ;;  %s236_s4 = inlined_call_operand.hbm [shape: f32[2,8], index: 4, kind: output, shape index: {}]  }
   0x1   :  { %v22_v0 = vld [vmem:[%s233_s1 + $0x18] sm:$0xff]  ;;  %v21_v1 = vld [vmem:[%s233_s1 + $0x10] sm:$0xff]  ;;  %v20_v3 = vld [vmem:[%s233_s1 + $0x8] sm:$0xff] }
   0x2   :  { %43 = vmatpush.msra.mxu0 %v22_v0  ;;  %v69_v2 = vld [vmem:[%s235_s3 + $0x78] sm:$0xff]  ;;  %v68_v4 = vld [vmem:[%s235_s3 + $0x70] sm:$0xff]  ;;  %v67_v5 = vld [vmem:[%s235_s3 + $0x68] sm:$0xff] }
   0x3   :  { %70 = vmatpush.msra.mxu1 %v69_v2  ;;  %v19_v6 = vld [vmem:[%s233_s1] sm:$0xff] }
   0x4   :  { %44 = vmatpush.msra.mxu0 %v21_v1  ;;  %v18_v7 = vld [vmem:[%s232_s0] sm:$0x3] }
   0x5   :  { %71 = vmatpush.msra.mxu1 %v68_v4  ;;  %v66_v8 = vld [vmem:[%s235_s3 + $0x60] sm:$0xff] }
   0x6   :  { %45 = vmatpush.msra.mxu0 %v20_v3 }
   0x7   :  { %72 = vmatpush.msra.mxu1 %v67_v5 }
   0x8   :  { %9 = vsyncpa [#allocation3], 0  ;;  %46 = vmatpush.msra.mxu0 %v19_v6  ;;  %v65_v9 = vld [vmem:[%s235_s3 + $0x58] sm:$0xff]  ;;  %v64_v10 = vld [vmem:[%s235_s3 + $0x50] sm:$0xff]  ;;  %s137_s5 = smov [#allocation2]   ;;  %s99_s1 = sshll.u32 %s236_s4, 4  ;;  %s100_s1 = int_to_ptr.hbm [resolvable:$true] %s99_s1 }
   0x9   :  { %108 = vmatmul.msk.f32.vlgmr.msra.gmra.mxu0 %vm27_vm0, %v18_v7  ;;  %73 = vmatpush.msra.mxu1 %v66_v8  ;;  %v63_v11 = vld [vmem:[%s235_s3 + $0x48] sm:$0xff]  ;;  %v62_v12 = vld [vmem:[%s235_s3 + $0x40] sm:$0xff]  ;;  %v61_v13 = vld [vmem:[%s235_s3 + $0x38] sm:$0xff]  ;;  %s97_s6 = sshll.u32 %s137_s5, 4  ;;  %vm90_vm2 = vcmask 58368   ;;  %s98_s6 = int_to_ptr.vmem [resolvable:$true] %s97_s6 }
   0xa   :  { %v60_v14 = vld [vmem:[%s235_s3 + $0x30] sm:$0xff]  ;;  %v59_v15 = vld [vmem:[%s235_s3 + $0x28] sm:$0xff]  ;;  %v58_v16 = vld [vmem:[%s235_s3 + $0x20] sm:$0xff] }
   0xb   :  { %74 = vmatpush.msra.mxu1 %v65_v9  ;;  %v57_v17 = vld [vmem:[%s235_s3 + $0x18] sm:$0xff]  ;;  %v56_v18 = vld [vmem:[%s235_s3 + $0x10] sm:$0xff]  ;;  %v55_v19 = vld [vmem:[%s235_s3 + $0x8] sm:$0xff] }
   0xc   :  { %v54_v20 = vld [vmem:[%s235_s3] sm:$0xff] }
   0xd   :  { %75 = vmatpush.msra.mxu1 %v64_v10  ;;  %v110_v21 = vld [vmem:[%s234_s2] ss:$0 sm:$0xff] }
   0xf   :  { %76 = vmatpush.msra.mxu1 %v63_v11 }
  0x11   :  { %77 = vmatpush.msra.mxu1 %v62_v12 }
  0x13   :  { %78 = vmatpush.msra.mxu1 %v61_v13 }
  0x15   :  { %79 = vmatpush.msra.mxu1 %v60_v14 }
  0x17   :  { %80 = vmatpush.msra.mxu1 %v59_v15 }
  0x19   :  { %81 = vmatpush.msra.mxu1 %v58_v16 }
  0x1b   :  { %82 = vmatpush.msra.mxu1 %v57_v17 }
  0x1d   :  { %83 = vmatpush.msra.mxu1 %v56_v18 }
  0x1f   :  { %84 = vmatpush.msra.mxu1 %v55_v19 }
  0x21   :  { %85 = vmatpush.msra.mxu1 %v54_v20 }
  0x86   :  { %v48_v22 = vpop.f32.mrf.mxu0 }
  0x87   :  { %v49_v23 = vadd.f32 %v110_v21, %v48_v22 }
  0x89   :  { %vm51_vm1 = vcmp.gt.f32.partialorder %v49_v23, 0.0  ;;  %v52_v24 = vmul.f32 0.01, %v49_v23 }
  0x8b   :  { %v53_v25 = vsel %vm51_vm1, %v49_v23, %v52_v24 }
  0x8c   :  { %86 = vmatmul.f32.vlgmr.msra.gmra.mxu1 %v53_v25 }
 0x109   :  { %v87_v26 = vpop.f32.mrf.mxu1 }
 0x10a   :  { %91 = vst.msk [vmem:[#allocation2] sm:$0x3] %vm90_vm2, %v87_v26 }
 0x10b   :  { %102 = dma.vmem_to_hbm [thread:$0]  %s98_s6, 32, %s100_s1, [#allocation3]  }
 0x10c   :  { %135 = dma.done.wait [#allocation3], 32  }
 0x10d   :  { %136 = vsyncadd [#allocation3], 4294967264 }
 0x10e   :  { %107 = vsyncpa [#allocation3], 1 }

</bundles_post_ra>
